<compile_context>
chip_gen: v7x
topology: tpu7x:2x2x1
jax: 0.10.0
libtpu: 0.0.40
codegen_flags: <defaults>
</compile_context>

<pallas_src>
import math
import jax
import jax.numpy as jnp
from jax.experimental import pallas as pl
from jax.experimental.pallas import tpu as pltpu

SELU_ALPHA = 1.6732632423543772
SELU_SCALE = 1.0507009873554805


def _kgcn_kernel(x_ref, adiag_ref, theta_ref, bias_ref, o_ref):
    # x_ref:     (M, T)      all batches' node rows, flattened (M = B*N)
    # adiag_ref: (M, 1)      diag(A_hat) replicated per batch
    # theta_ref: (T, Hp)     Theta1 zero-padded to lane-dense Hp (multiple of 128)
    # bias_ref:  (1, Hp)     bias zero-padded
    # o_ref:     (M, Hp)     lane-dense output slab
    feats = x_ref[...] * adiag_ref[...]                      # row scale (VPU)
    t2 = jnp.dot(feats, theta_ref[...],
                 preferred_element_type=jnp.float32)         # (M, Hp) on MXU
    t2 = t2 + bias_ref[...]
    # SELU; clamp exp arg so the discarded positive branch never produces inf.
    neg = SELU_ALPHA * (jnp.exp(jnp.minimum(t2, 0.0)) - 1.0)
    out = SELU_SCALE * jnp.where(t2 > 0.0, t2, neg)
    o_ref[...] = out.astype(o_ref.dtype)


def k_gcn_forward(X, A_hat, Theta1, bias, activation="selu"):
    """X: (B, N, T) float32, A_hat: (N, N), Theta1: (T, H), bias: (H,)."""
    assert activation == "selu", "only 'selu' path implemented (module default)"
    B, N, T = X.shape
    H = Theta1.shape[1]
    M = B * N
    Hp = max(128, ((H + 127) // 128) * 128)   # lane-dense output width

    # Glue (outside the kernel): extract the 'kk' diagonal, flatten batch,
    # zero-pad the output feature dim to a multiple of 128 lanes.
    a_diag = jnp.diagonal(A_hat).astype(jnp.float32)                     # (N,)
    a_diag = jnp.broadcast_to(a_diag[None, :], (B, N)).reshape(M, 1)     # (M,1)
    x2d = X.reshape(M, T).astype(jnp.float32)                            # (M,T)
    theta_p = jnp.zeros((T, Hp), jnp.float32).at[:, :H].set(
        Theta1.astype(jnp.float32))
    bias_p = jnp.zeros((1, Hp), jnp.float32).at[:, :H].set(
        bias.astype(jnp.float32))

    cost = pl.CostEstimate(
        flops=2 * M * T * Hp,
        transcendentals=M * Hp,                       # SELU exp
        bytes_accessed=4 * (M * T + M + T * Hp + Hp + M * Hp),
    )

    out = pl.pallas_call(
        _kgcn_kernel,
        out_shape=jax.ShapeDtypeStruct((M, Hp), jnp.float32),
        grid_spec=pltpu.PrefetchScalarGridSpec(
            num_scalar_prefetch=0,
            grid=(1,),                                # single step: no per-batch
            in_specs=[                                # pipeline overhead
                pl.BlockSpec((M, T),  lambda i: (0, 0)),
                pl.BlockSpec((M, 1),  lambda i: (0, 0)),
                pl.BlockSpec((T, Hp), lambda i: (0, 0)),
                pl.BlockSpec((1, Hp), lambda i: (0, 0)),
            ],
            out_specs=pl.BlockSpec((M, Hp), lambda i: (0, 0)),
        ),
        compiler_params=pltpu.CompilerParams(
            dimension_semantics=("arbitrary",)),
        cost_estimate=cost,
    )(x2d, a_diag, theta_p, bias_p)

    # Drop lane padding and restore (B, N, H).
    return out[:, :H].reshape(B, N, H)


def _reference(X, A_hat, Theta1, bias):
    feats = jnp.einsum('kk,bkj->bkj', A_hat, X)
    t2 = jnp.einsum('bkj,jh->bkh', feats, Theta1) + bias
    return SELU_SCALE * jnp.where(t2 > 0, t2, SELU_ALPHA * (jnp.exp(t2) - 1.0))


if __name__ == "__main__":
    # Small shapes consistent with the module:
    #   batch=2, num_nodes=16, in_channels(=timesteps)=8, out_channels=32
    B, N, T, H = 2, 16, 8, 32

    key = jax.random.PRNGKey(0)
    kx, ka, kt, kb = jax.random.split(key, 4)

    X = jax.random.normal(kx, (B, N, T), dtype=jnp.float32)
    # Symmetric normalized-ish adjacency (values in [0,1))
    A_raw = jax.random.uniform(ka, (N, N), dtype=jnp.float32)
    A_hat = 0.5 * (A_raw + A_raw.T)

    # Deterministic parameter init mirroring reset_parameters():
    stdv = 1.0 / math.sqrt(H)
    Theta1 = jax.random.uniform(kt, (T, H), minval=-stdv, maxval=stdv,
                                dtype=jnp.float32)
    stdv1 = 1.0 / math.sqrt(H)
    bias = jax.random.uniform(kb, (H,), minval=-stdv1, maxval=stdv1,
                              dtype=jnp.float32)

    out = k_gcn_forward(X, A_hat, Theta1, bias)
    out = jax.block_until_ready(out)

    ref = _reference(X, A_hat, Theta1, bias)
    assert out.shape == (B, N, H)
    assert jnp.allclose(out, ref, atol=1e-5, rtol=1e-5), "mismatch vs reference"

    print("KERNEL_OK")
</pallas_src>

<mosaic_0001>
module attributes {stable_mosaic.version = 11 : i64} {
  func.func @_kgcn_kernel(%arg0: i32, %arg1: memref<32x8xf32, #tpu.memory_space<vmem>>, %arg2: memref<32x1xf32, #tpu.memory_space<vmem>>, %arg3: memref<8x128xf32, #tpu.memory_space<vmem>>, %arg4: memref<1x128xf32, #tpu.memory_space<vmem>>, %arg5: memref<32x128xf32, #tpu.memory_space<vmem>>) attributes {dimension_semantics = [#tpu.dimension_semantics<arbitrary>], iteration_bounds = array<i64: 1>, scalar_prefetch = 0 : i64, scratch_operands = 0 : i64, tpu.core_type = #tpu.core_type<tc>, window_params = [{pipeline_mode = #tpu.pipeline_mode<synchronous>, transform_indices = @transform_0, window_bounds = array<i64: 32, 8>}, {pipeline_mode = #tpu.pipeline_mode<synchronous>, transform_indices = @transform_1, window_bounds = array<i64: 32, 1>}, {pipeline_mode = #tpu.pipeline_mode<synchronous>, transform_indices = @transform_2, window_bounds = array<i64: 8, 128>}, {pipeline_mode = #tpu.pipeline_mode<synchronous>, transform_indices = @transform_3, window_bounds = array<i64: 1, 128>}, {pipeline_mode = #tpu.pipeline_mode<synchronous>, transform_indices = @transform_4, window_bounds = array<i64: 32, 128>}]} {
    %c0 = arith.constant 0 : index
    %c0_0 = arith.constant 0 : index
    %0 = vector.load %arg1[%c0, %c0_0] : memref<32x8xf32, #tpu.memory_space<vmem>>, vector<32x8xf32>
    %c0_1 = arith.constant 0 : index
    %c0_2 = arith.constant 0 : index
    %1 = vector.load %arg2[%c0_1, %c0_2] : memref<32x1xf32, #tpu.memory_space<vmem>>, vector<32x1xf32>
    %2 = vector.broadcast %1 : vector<32x1xf32> to vector<32x8xf32>
    %3 = arith.mulf %0, %2 : vector<32x8xf32>
    %c0_3 = arith.constant 0 : index
    %c0_4 = arith.constant 0 : index
    %4 = vector.load %arg3[%c0_3, %c0_4] : memref<8x128xf32, #tpu.memory_space<vmem>>, vector<8x128xf32>
    %cst = arith.constant dense<0.000000e+00> : vector<32x128xf32>
    %5 = tpu.matmul %3, %4, %cst {dimension_numbers = #tpu.dot_dimension_numbers<[1], [0], [0], [1], [0, 0, 1, 1], [], []>} : vector<32x8xf32>, vector<8x128xf32>, vector<32x128xf32> -> vector<32x128xf32>
    %c0_5 = arith.constant 0 : index
    %c0_6 = arith.constant 0 : index
    %6 = vector.load %arg4[%c0_5, %c0_6] : memref<1x128xf32, #tpu.memory_space<vmem>>, vector<1x128xf32>
    %7 = vector.broadcast %6 : vector<1x128xf32> to vector<32x128xf32>
    %8 = arith.addf %5, %7 : vector<32x128xf32>
    %cst_7 = arith.constant 0.000000e+00 : f32
    %9 = vector.broadcast %cst_7 : f32 to vector<32x128xf32>
    %10 = arith.minimumf %8, %9 : vector<32x128xf32>
    %11 = math.exp %10 : vector<32x128xf32>
    %cst_8 = arith.constant 1.000000e+00 : f32
    %12 = vector.broadcast %cst_8 : f32 to vector<32x128xf32>
    %13 = arith.subf %11, %12 : vector<32x128xf32>
    %cst_9 = arith.constant 1.67326319 : f32
    %14 = vector.broadcast %cst_9 : f32 to vector<32x128xf32>
    %15 = arith.mulf %14, %13 : vector<32x128xf32>
    %cst_10 = arith.constant 0.000000e+00 : f32
    %16 = vector.broadcast %cst_10 : f32 to vector<32x128xf32>
    %17 = arith.cmpf ogt, %8, %16 : vector<32x128xf32>
    %18 = arith.select %17, %8, %15 : vector<32x128xi1>, vector<32x128xf32>
    %cst_11 = arith.constant 1.05070102 : f32
    %19 = vector.broadcast %cst_11 : f32 to vector<32x128xf32>
    %20 = arith.mulf %19, %18 : vector<32x128xf32>
    %c0_12 = arith.constant 0 : index
    %c0_13 = arith.constant 0 : index
    %21 = vector.load %arg5[%c0_12, %c0_13] : memref<32x128xf32, #tpu.memory_space<vmem>>, vector<32x128xf32>
    tpu.vector_store %arg5[%c0_12, %c0_13], %20 {strides = array<i32>} : memref<32x128xf32, #tpu.memory_space<vmem>>, vector<32x128xf32>,
    return
  }
  func.func @transform_0(%arg0: i32) -> (i32, i32) {
    %c0_i32 = arith.constant 0 : i32
    %c0_i32_0 = arith.constant 0 : i32
    %c0_i32_1 = arith.constant 0 : i32
    return %c0_i32, %c0_i32_0 : i32, i32
  }
  func.func @transform_1(%arg0: i32) -> (i32, i32) {
    %c0_i32 = arith.constant 0 : i32
    %c0_i32_0 = arith.constant 0 : i32
    %c0_i32_1 = arith.constant 0 : i32
    return %c0_i32, %c0_i32_0 : i32, i32
  }
  func.func @transform_2(%arg0: i32) -> (i32, i32) {
    %c0_i32 = arith.constant 0 : i32
    %c0_i32_0 = arith.constant 0 : i32
    %c0_i32_1 = arith.constant 0 : i32
    return %c0_i32, %c0_i32_0 : i32, i32
  }
  func.func @transform_3(%arg0: i32) -> (i32, i32) {
    %c0_i32 = arith.constant 0 : i32
    %c0_i32_0 = arith.constant 0 : i32
    %c0_i32_1 = arith.constant 0 : i32
    return %c0_i32, %c0_i32_0 : i32, i32
  }
  func.func @transform_4(%arg0: i32) -> (i32, i32) {
    %c0_i32 = arith.constant 0 : i32
    %c0_i32_0 = arith.constant 0 : i32
    %c0_i32_1 = arith.constant 0 : i32
    return %c0_i32, %c0_i32_0 : i32, i32
  }
}

</mosaic_0001>

<bundles_post_ra>
// kernel: tpu_custom_call.1
= control target key start
LH: loop header
LB: loop body
LE: loop exit
PB: predicated region body
PF: predicated region fallthrough
CT: control target
= control target key end

     0   :  { %v270_v2 = vmov 0   ;;  %s341_s0 = inlined_call_operand.vmem [shape: f32[32,8], index: 0, kind: input, shape index: {}]   ;;  %s342_s1 = inlined_call_operand.vmem [shape: f32[32,1], index: 1, kind: input, shape index: {}]   ;;  %s343_s2 = inlined_call_operand.vmem [shape: f32[8,128], index: 2, kind: input, shape index: {}]   ;;  %s344_s3 = inlined_call_operand.vmem [shape: f32[1,128], index: 3, kind: input, shape index: {}]   ;;  %s345_s4 = inlined_call_operand.hbm [shape: f32[32,128], index: 4, kind: output, shape index: {}]  }
   0x1   :  { %v23_v0 = vld [vmem:[%s342_s1 + $0x8] sm:$0xff]  ;;  %v22_v1 = vld [vmem:[%s342_s1] sm:$0xff]  ;;  %237 = vset.pattern.permute.xlu1 %v270_v2  ;;  %236 = vset.pattern.permute.xlu0 %v270_v2 }
   0x2   :  { %33 = vperm.xlu1 %237, %v23_v0   ;;  %28 = vperm.xlu0 %236, %v22_v1   ;;  %v50_v3 = vld [vmem:[%s343_s2] sm:$0xff] }
   0x3   :  { %9 = vsyncpa [#allocation3], 0  ;;  %v25_v4 = vld [vmem:[%s342_s1 + $0x18] sm:$0xff]  ;;  %v24_v5 = vld [vmem:[%s342_s1 + $0x10] sm:$0xff]  ;;  %222 = vmatprep.subr.mxu0 %v50_v3  ;;  %230 = vmatprep.subr.mxu1 %v50_v3  ;;  %vm58_vm0 = vcmask 64512  }
   0x4   :  { %223 = vmatpush3.msra.mxu0 %v50_v3  ;;  %231 = vmatpush3.msra.mxu1 %v50_v3  ;;  %v19_v6 = vld [vmem:[%s341_s0 + $0x8] sm:$0xff]  ;;  %v18_v7 = vld [vmem:[%s341_s0] sm:$0xff]  ;;  %v21_v12 = vld [vmem:[%s341_s0 + $0x18] sm:$0xff] }
   0x5   :  { %v20_v13 = vld [vmem:[%s341_s0 + $0x10] sm:$0xff]  ;;  %v208_v18 = vld [vmem:[%s344_s3] ss:$0 sm:$0xff]  ;;  %s271_s0 = smov [#allocation2]  }
   0x6   :  { %43 = vperm.xlu1 %237, %v25_v4   ;;  %38 = vperm.xlu0 %236, %v24_v5   ;;  %s197_s3 = sshll.u32 %s271_s0, 4  ;;  %s198_s3 = int_to_ptr.vmem [resolvable:$true] %s197_s3 }
   0x7   :  { %s246_s7 = scalar_lea.vmem %s198_s3, 512  ;;  %p251_p1 = scmp.lt.s32.totalorder %s198_s3, %s198_s3 }
   0x8   :  { %p247_p0 = scmp.ne.s32.totalorder %s198_s3, %s246_s7  ;;  %p252_p2 = scmp.lt.s32.totalorder %s246_s7, %s246_s7 }
   0xa   :  { %p253_p3 = por %p252_p2, %p251_p1 }
   0xc   :  { %p254_p4 = pnand %p253_p3, %p247_p0 }
  0x81   :  { %v34_v8 = vpop.permute.xlu1 %33  ;;  %v29_v9 = vpop.permute.xlu0 %28 }
  0x82   :  { %v47_v10 = vmul.f32 %v34_v8, %v19_v6  ;;  %v46_v11 = vmul.f32 %v29_v9, %v18_v7 }
  0x84   :  { %224 = vmatprep.mubr.msk.f32.mxu0 %vm58_vm0, %v46_v11 }
  0x85   :  { %v44_v14 = vpop.permute.xlu1 %43  ;;  %v39_v15 = vpop.permute.xlu0 %38  ;;  %225 = vmatmul.mubr.msk.f32.vlgmr.msra.gmra.mrb[0].mxu0 %vm58_vm0, %v47_v10 }
  0x86   :  { %v49_v16 = vmul.f32 %v44_v14, %v21_v12  ;;  %v48_v17 = vmul.f32 %v39_v15, %v20_v13 }
  0x88   :  { %227 = vmatprep.mubr.msk.f32.mxu1 %vm58_vm0, %v48_v17 }
  0x89   :  { %228 = vmatmul.mubr.msk.f32.vlgmr.msra.gmra.mrb[0].mxu1 %vm58_vm0, %v49_v16 }
 0x158   :  { %v226_v19 = vpop.f32.mrb[0].mxu0 }
 0x159   :  { %v143_v20 = vadd.f32 %v226_v19, %v208_v18  ;;  %v137_v21 = vpop.f32.mrb[1].mxu0 }
 0x15a   :  { %v138_v22 = vadd.f32 %v208_v18, %v137_v21 }
 0x15b   :  { %v157_v23 = vmin.f32 %v143_v20, 0.0  ;;  %vm177_vm1 = vcmp.gt.f32.partialorder %v143_v20, 0.0 }
 0x15c   :  { %v156_v24 = vmin.f32 %v138_v22, 0.0  ;;  %v229_v25 = vpop.f32.mrb[0].mxu1  ;;  %vm176_vm2 = vcmp.gt.f32.partialorder %v138_v22, 0.0 }
 0x15d   :  { %v162_v26 = vmul.f32 1.442695, %v157_v23  ;;  %v153_v27 = vadd.f32 %v229_v25, %v208_v18  ;;  %v147_v28 = vpop.f32.mrb[1].mxu1 }
 0x15e   :  { %v160_v29 = vmul.f32 1.442695, %v156_v24  ;;  %v148_v30 = vadd.f32 %v208_v18, %v147_v28 }
 0x15f   :  { %238 = vpow2.f32 %v162_v26  ;;  %v159_v31 = vmin.f32 %v153_v27, 0.0  ;;  %vm179_vm3 = vcmp.gt.f32.partialorder %v153_v27, 0.0 }
 0x160   :  { %240 = vpow2.f32 %v160_v29  ;;  %v158_v32 = vmin.f32 %v148_v30, 0.0  ;;  %vm178_vm4 = vcmp.gt.f32.partialorder %v148_v30, 0.0 }
 0x161   :  { %v166_v33 = vmul.f32 1.442695, %v159_v31 }
 0x162   :  { %v164_v34 = vmul.f32 1.442695, %v158_v32 }
 0x163   :  { %242 = vpow2.f32 %v166_v33 }
 0x164   :  { %244 = vpow2.f32 %v164_v34 }
 0x169   :  { %v239_v35 = vpop.eup %238 }
 0x16a   :  { %v241_v36 = vpop.eup %240  ;;  %v214_v37 = vadd.f32 -1.0, %v239_v35 }
 0x16b   :  { %v213_v38 = vadd.f32 -1.0, %v241_v36 }
 0x16c   :  { %v173_v39 = vmul.f32 1.6732632, %v214_v37 }
 0x16d   :  { %v243_v40 = vpop.eup %242  ;;  %v172_v41 = vmul.f32 1.6732632, %v213_v38 }
 0x16e   :  { %v245_v42 = vpop.eup %244  ;;  %v181_v43 = vsel %vm177_vm1, %v143_v20, %v173_v39  ;;  %v216_v44 = vadd.f32 -1.0, %v243_v40 }
 0x16f   :  { %v185_v45 = vmul.f32 1.050701, %v181_v43  ;;  %v180_v46 = vsel %vm176_vm2, %v138_v22, %v172_v41  ;;  %v215_v47 = vadd.f32 -1.0, %v245_v42 }
 0x170   :  { %v184_v48 = vmul.f32 1.050701, %v180_v46  ;;  %v175_v49 = vmul.f32 1.6732632, %v216_v44 }
 0x171   :  { %189 = vst [vmem:[#allocation2 + $0x8] sm:$0xff] %v185_v45  ;;  %v174_v50 = vmul.f32 1.6732632, %v215_v47 }
 0x172   :  { %188 = vst [vmem:[#allocation2] sm:$0xff] %v184_v48  ;;  %v183_v51 = vsel %vm179_vm3, %v153_v27, %v175_v49 }
 0x173   :  { %v187_v52 = vmul.f32 1.050701, %v183_v51  ;;  %v182_v53 = vsel %vm178_vm4, %v148_v30, %v174_v50 }
 0x174   :  { %v186_v54 = vmul.f32 1.050701, %v182_v53 }
 0x175   :  { %191 = vst [vmem:[#allocation2 + $0x18] sm:$0xff] %v187_v52 }
 0x176   :  { %190 = vst [vmem:[#allocation2 + $0x10] sm:$0xff] %v186_v54 }
 0x177   :  { %257 = shalt.err (!%p254_p4)
}
 0x178   :  { %s258_s10 = scalar_lea.hbm %s345_s4, 512 }
 0x179   :  { %p259_p5 = scmp.ne.s32.totalorder %s345_s4, %s258_s10  ;;  %p262_p6 = scmp.lt.u32.totalorder %s258_s10, %s345_s4 }
 0x17b   :  { %p264_p7 = pnand %p262_p6, %p259_p5 }
 0x17d   :  { %267 = shalt.err (!%p264_p7)
}
 0x17e   :  { %s272_s15 = smov 128   ;;  %s273_s16 = smov 8  }
 0x17f   :  { %203 = dma.vmem_to_hbm [thread:$0]  %s198_s3, 512, %s345_s4, [#allocation3], %s272_s15, %s272_s15, %s273_s16  }
 0x180   :  { %268 = dma.done.wait [#allocation3], 512  }
 0x181   :  { %269 = vsyncadd [#allocation3], 4294966784 }
 0x182   :  { %207 = vsyncpa [#allocation3], 1 }

</bundles_post_ra>
